<compile_context>
chip_gen: v6e
topology: v6e:2x2x1
jax: 0.10.0
libtpu: 0.0.40
codegen_flags: <defaults>
</compile_context>

<pallas_src>
import functools

import jax
import jax.numpy as jnp
from jax import lax
from jax.experimental import pallas as pl
from jax.experimental.pallas import tpu as pltpu

MEAN = 0.0
STD = 0.15

_BLOCK_R = 256     # sublane-axis tile (multiple of 8); block = 256x1024 f32 = 1 MiB
_MAX_COLS = 1024   # lane-axis slab width (multiple of 128)


def _round_up(a, b):
    return -(-a // b) * b


def _uniform_from_index(gid_u32, seed_u32):
    """Counter-based PRNG: hash(global element index, seed) -> uniform in (0, 1)."""
    k = gid_u32 * jnp.uint32(0x9E3779B1) + seed_u32 * jnp.uint32(0x85EBCA77)
    # lowbias32-style finalizer: good avalanche on sequential counters.
    k = k ^ (k >> 16)
    k = k * jnp.uint32(0x7FEB352D)
    k = k ^ (k >> 15)
    k = k * jnp.uint32(0x846CA68B)
    k = k ^ (k >> 16)
    # Top 23 bits -> float strictly inside (0, 1): u in [2^-24, 1 - 2^-24].
    mant = (k >> 9).astype(jnp.int32).astype(jnp.float32)
    return (mant + 0.5) * jnp.float32(2.0 ** -23)


def _inv_normal_cdf(p):
    """Acklam's rational approximation of the standard-normal inverse CDF.

    Uses only log/sqrt/polynomials/selects (VPU + EUP friendly, and supported
    by the Pallas interpreter).  More than accurate enough for noise synthesis.
    """
    a0, a1, a2, a3, a4, a5 = (-3.969683028665376e+01, 2.209460984245205e+02,
                              -2.759285104469687e+02, 1.383577518672690e+02,
                              -3.066479806614716e+01, 2.506628277459239e+00)
    b0, b1, b2, b3, b4 = (-5.447609879822406e+01, 1.615858368580409e+02,
                          -1.556989798598866e+02, 6.680131188771972e+01,
                          -1.328068155288572e+01)
    c0, c1, c2, c3, c4, c5 = (-7.784894002430293e-03, -3.223964580411365e-01,
                              -2.400758277161838e+00, -2.549732539343734e+00,
                              4.374664141464968e+00, 2.938163982698783e+00)
    d0, d1, d2, d3 = (7.784695709041462e-03, 3.224671290700398e-01,
                      2.445134137142996e+00, 3.754408661907416e+00)
    p_low = 0.02425

    # Central region.
    q = p - 0.5
    r = q * q
    num_c = ((((a0 * r + a1) * r + a2) * r + a3) * r + a4) * r + a5
    den_c = ((((b0 * r + b1) * r + b2) * r + b3) * r + b4) * r + 1.0
    x_central = num_c * q / den_c

    # Tails: evaluate at min(p, 1-p), flip sign for the upper tail.
    pt = jnp.minimum(p, 1.0 - p)             # > 0 by construction of p
    s = jnp.sqrt(-2.0 * jnp.log(pt))
    num_t = ((((c0 * s + c1) * s + c2) * s + c3) * s + c4) * s + c5
    den_t = (((d0 * s + d1) * s + d2) * s + d3) * s + 1.0
    x_tail = num_t / den_t                   # left-tail (negative) value
    x_tail = jnp.where(p > 0.5, -x_tail, x_tail)

    return jnp.where(jnp.abs(q) <= 0.5 - p_low, x_central, x_tail)


def _gaussian_noise_kernel(seed_ref, x_ref, o_ref, *, block_r, slab_cols,
                           mean, std):
    # Global element index of every lane in this tile (grid-invariant noise).
    blk = pl.program_id(0)
    r_idx = lax.broadcasted_iota(jnp.int32, (block_r, slab_cols), 0)
    c_idx = lax.broadcasted_iota(jnp.int32, (block_r, slab_cols), 1)
    gid = ((blk * block_r + r_idx) * slab_cols + c_idx).astype(jnp.uint32)

    seed_u = jnp.uint32(seed_ref[0])
    u = _uniform_from_index(gid, seed_u)
    z = _inv_normal_cdf(u)
    noise = jnp.float32(mean) + jnp.float32(std) * z

    o_ref[...] = (x_ref[...].astype(jnp.float32) + noise).astype(o_ref.dtype)


def gaussian_noise(x, seed, mean=MEAN, std=STD):
    """x: float array of any shape (e.g. NCHW). Returns x + N(mean, std) noise."""
    orig_shape = x.shape
    total = x.size

    # Lane/sublane-dense slab: cols multiple of 128 (<= 1024), rows % 8 == 0.
    cols = _MAX_COLS
    while cols > 128 and total < 8 * cols:
        cols //= 2
    rows = _round_up(_round_up(total, cols) // cols, 8)
    block_r = min(rows, _BLOCK_R)
    rows = _round_up(rows, block_r)          # exact tiling, no edge blocks
    padded = rows * cols

    flat = x.reshape(-1)
    if padded != total:
        flat = jnp.pad(flat, (0, padded - total))
    slab = flat.reshape(rows, cols)

    seed_arr = jnp.asarray([seed], dtype=jnp.int32)

    kernel = functools.partial(
        _gaussian_noise_kernel,
        block_r=block_r, slab_cols=cols, mean=float(mean), std=float(std))

    out = pl.pallas_call(
        kernel,
        out_shape=jax.ShapeDtypeStruct((rows, cols), x.dtype),
        grid_spec=pltpu.PrefetchScalarGridSpec(
            num_scalar_prefetch=1,
            grid=(rows // block_r,),
            in_specs=[pl.BlockSpec((block_r, cols), lambda i, s_ref: (i, 0))],
            out_specs=pl.BlockSpec((block_r, cols), lambda i, s_ref: (i, 0)),
        ),
        compiler_params=pltpu.CompilerParams(
            dimension_semantics=("parallel",)),
    )(seed_arr, slab)

    out_flat = out.reshape(-1)
    if padded != total:
        out_flat = out_flat[:total]
    return out_flat.reshape(orig_shape)


if __name__ == "__main__":
    # Small shapes consistent with the module (batch=2, input_size=(4,16,16)).
    key = jax.random.PRNGKey(0)
    x = jax.random.normal(key, (2, 4, 16, 16), dtype=jnp.float32)

    y = gaussian_noise(x, seed=0)
    y = jax.block_until_ready(y)

    assert y.shape == x.shape and y.dtype == x.dtype
    # Noise has std 0.15 > 0, so output must differ from input.
    assert not bool(jnp.allclose(y, x))
    # Sanity: the added noise should have roughly the requested mean/std.
    noise = (y - x).astype(jnp.float32)
    assert float(jnp.abs(jnp.std(noise) - STD)) < 0.05
    assert float(jnp.abs(jnp.mean(noise) - MEAN)) < 0.05

    print("KERNEL_OK")
</pallas_src>

<mosaic_0001>
module attributes {stable_mosaic.version = 11 : i64} {
  func.func @_gaussian_noise_kernel(%arg0: i32, %arg1: memref<1xi32, #tpu.memory_space<smem>>, %arg2: memref<8x256xf32, #tpu.memory_space<vmem>>, %arg3: memref<8x256xf32, #tpu.memory_space<vmem>>) attributes {dimension_semantics = [#tpu.dimension_semantics<parallel>], iteration_bounds = array<i64: 1>, scalar_prefetch = 1 : i64, scratch_operands = 0 : i64, tpu.core_type = #tpu.core_type<tc>, window_params = [{transform_indices = @transform_0, window_bounds = array<i64: 8, 256>}, {transform_indices = @transform_1, window_bounds = array<i64: 8, 256>}]} {
    %0 = tpu.iota {dimensions = array<i32: 0>} : vector<8x256xi32>
    %1 = tpu.iota {dimensions = array<i32: 1>} : vector<8x256xi32>
    %c8_i32 = arith.constant 8 : i32
    %2 = arith.muli %arg0, %c8_i32 : i32
    %3 = vector.broadcast %2 : i32 to vector<8x256xi32>
    %4 = arith.addi %3, %0 : vector<8x256xi32>
    %c256_i32 = arith.constant 256 : i32
    %5 = vector.broadcast %c256_i32 : i32 to vector<8x256xi32>
    %6 = arith.muli %4, %5 : vector<8x256xi32>
    %7 = arith.addi %6, %1 : vector<8x256xi32>
    %c0 = arith.constant 0 : index
    %8 = memref.load %arg1[%c0] : memref<1xi32, #tpu.memory_space<smem>>
    %c-1640531535_i32 = arith.constant -1640531535 : i32
    %9 = vector.broadcast %c-1640531535_i32 : i32 to vector<8x256xi32>
    %10 = arith.muli %7, %9 : vector<8x256xi32>
    %c-2048144777_i32 = arith.constant -2048144777 : i32
    %11 = arith.muli %8, %c-2048144777_i32 : i32
    %12 = vector.broadcast %11 : i32 to vector<8x256xi32>
    %13 = arith.addi %10, %12 : vector<8x256xi32>
    %c16_i32 = arith.constant 16 : i32
    %14 = vector.broadcast %c16_i32 : i32 to vector<8x256xi32>
    %15 = arith.shrui %13, %14 : vector<8x256xi32>
    %16 = arith.xori %13, %15 : vector<8x256xi32>
    %c2146121005_i32 = arith.constant 2146121005 : i32
    %17 = vector.broadcast %c2146121005_i32 : i32 to vector<8x256xi32>
    %18 = arith.muli %16, %17 : vector<8x256xi32>
    %c15_i32 = arith.constant 15 : i32
    %19 = vector.broadcast %c15_i32 : i32 to vector<8x256xi32>
    %20 = arith.shrui %18, %19 : vector<8x256xi32>
    %21 = arith.xori %18, %20 : vector<8x256xi32>
    %c-2073254261_i32 = arith.constant -2073254261 : i32
    %22 = vector.broadcast %c-2073254261_i32 : i32 to vector<8x256xi32>
    %23 = arith.muli %21, %22 : vector<8x256xi32>
    %c16_i32_0 = arith.constant 16 : i32
    %24 = vector.broadcast %c16_i32_0 : i32 to vector<8x256xi32>
    %25 = arith.shrui %23, %24 : vector<8x256xi32>
    %26 = arith.xori %23, %25 : vector<8x256xi32>
    %c9_i32 = arith.constant 9 : i32
    %27 = vector.broadcast %c9_i32 : i32 to vector<8x256xi32>
    %28 = arith.shrui %26, %27 : vector<8x256xi32>
    %29 = arith.sitofp %28 : vector<8x256xi32> to vector<8x256xf32>
    %cst = arith.constant 5.000000e-01 : f32
    %30 = vector.broadcast %cst : f32 to vector<8x256xf32>
    %31 = arith.addf %29, %30 : vector<8x256xf32>
    %cst_1 = arith.constant 1.1920929E-7 : f32
    %32 = vector.broadcast %cst_1 : f32 to vector<8x256xf32>
    %33 = arith.mulf %31, %32 : vector<8x256xf32>
    %cst_2 = arith.constant 5.000000e-01 : f32
    %34 = vector.broadcast %cst_2 : f32 to vector<8x256xf32>
    %35 = arith.subf %33, %34 : vector<8x256xf32>
    %36 = arith.mulf %35, %35 : vector<8x256xf32>
    %cst_3 = arith.constant -39.6968307 : f32
    %37 = vector.broadcast %cst_3 : f32 to vector<8x256xf32>
    %38 = arith.mulf %37, %36 : vector<8x256xf32>
    %cst_4 = arith.constant 220.946106 : f32
    %39 = vector.broadcast %cst_4 : f32 to vector<8x256xf32>
    %40 = arith.addf %38, %39 : vector<8x256xf32>
    %41 = arith.mulf %40, %36 : vector<8x256xf32>
    %cst_5 = arith.constant -275.928497 : f32
    %42 = vector.broadcast %cst_5 : f32 to vector<8x256xf32>
    %43 = arith.addf %41, %42 : vector<8x256xf32>
    %44 = arith.mulf %43, %36 : vector<8x256xf32>
    %cst_6 = arith.constant 138.357758 : f32
    %45 = vector.broadcast %cst_6 : f32 to vector<8x256xf32>
    %46 = arith.addf %44, %45 : vector<8x256xf32>
    %47 = arith.mulf %46, %36 : vector<8x256xf32>
    %cst_7 = arith.constant -30.6647987 : f32
    %48 = vector.broadcast %cst_7 : f32 to vector<8x256xf32>
    %49 = arith.addf %47, %48 : vector<8x256xf32>
    %50 = arith.mulf %49, %36 : vector<8x256xf32>
    %cst_8 = arith.constant 2.50662827 : f32
    %51 = vector.broadcast %cst_8 : f32 to vector<8x256xf32>
    %52 = arith.addf %50, %51 : vector<8x256xf32>
    %cst_9 = arith.constant -54.4760971 : f32
    %53 = vector.broadcast %cst_9 : f32 to vector<8x256xf32>
    %54 = arith.mulf %53, %36 : vector<8x256xf32>
    %cst_10 = arith.constant 161.585831 : f32
    %55 = vector.broadcast %cst_10 : f32 to vector<8x256xf32>
    %56 = arith.addf %54, %55 : vector<8x256xf32>
    %57 = arith.mulf %56, %36 : vector<8x256xf32>
    %cst_11 = arith.constant -155.698975 : f32
    %58 = vector.broadcast %cst_11 : f32 to vector<8x256xf32>
    %59 = arith.addf %57, %58 : vector<8x256xf32>
    %60 = arith.mulf %59, %36 : vector<8x256xf32>
    %cst_12 = arith.constant 66.8013153 : f32
    %61 = vector.broadcast %cst_12 : f32 to vector<8x256xf32>
    %62 = arith.addf %60, %61 : vector<8x256xf32>
    %63 = arith.mulf %62, %36 : vector<8x256xf32>
    %cst_13 = arith.constant -13.2806816 : f32
    %64 = vector.broadcast %cst_13 : f32 to vector<8x256xf32>
    %65 = arith.addf %63, %64 : vector<8x256xf32>
    %66 = arith.mulf %65, %36 : vector<8x256xf32>
    %cst_14 = arith.constant 1.000000e+00 : f32
    %67 = vector.broadcast %cst_14 : f32 to vector<8x256xf32>
    %68 = arith.addf %66, %67 : vector<8x256xf32>
    %69 = arith.mulf %52, %35 : vector<8x256xf32>
    %70 = arith.divf %69, %68 : vector<8x256xf32>
    %cst_15 = arith.constant 1.000000e+00 : f32
    %71 = vector.broadcast %cst_15 : f32 to vector<8x256xf32>
    %72 = arith.subf %71, %33 : vector<8x256xf32>
    %73 = arith.minimumf %33, %72 : vector<8x256xf32>
    %74 = math.log %73 : vector<8x256xf32>
    %cst_16 = arith.constant -2.000000e+00 : f32
    %75 = vector.broadcast %cst_16 : f32 to vector<8x256xf32>
    %76 = arith.mulf %75, %74 : vector<8x256xf32>
    %77 = math.sqrt %76 : vector<8x256xf32>
    %cst_17 = arith.constant -0.0077848942 : f32
    %78 = vector.broadcast %cst_17 : f32 to vector<8x256xf32>
    %79 = arith.mulf %78, %77 : vector<8x256xf32>
    %cst_18 = arith.constant -0.322396457 : f32
    %80 = vector.broadcast %cst_18 : f32 to vector<8x256xf32>
    %81 = arith.addf %79, %80 : vector<8x256xf32>
    %82 = arith.mulf %81, %77 : vector<8x256xf32>
    %cst_19 = arith.constant -2.40075827 : f32
    %83 = vector.broadcast %cst_19 : f32 to vector<8x256xf32>
    %84 = arith.addf %82, %83 : vector<8x256xf32>
    %85 = arith.mulf %84, %77 : vector<8x256xf32>
    %cst_20 = arith.constant -2.54973245 : f32
    %86 = vector.broadcast %cst_20 : f32 to vector<8x256xf32>
    %87 = arith.addf %85, %86 : vector<8x256xf32>
    %88 = arith.mulf %87, %77 : vector<8x256xf32>
    %cst_21 = arith.constant 4.37466431 : f32
    %89 = vector.broadcast %cst_21 : f32 to vector<8x256xf32>
    %90 = arith.addf %88, %89 : vector<8x256xf32>
    %91 = arith.mulf %90, %77 : vector<8x256xf32>
    %cst_22 = arith.constant 2.938164 : f32
    %92 = vector.broadcast %cst_22 : f32 to vector<8x256xf32>
    %93 = arith.addf %91, %92 : vector<8x256xf32>
    %cst_23 = arith.constant 0.00778469583 : f32
    %94 = vector.broadcast %cst_23 : f32 to vector<8x256xf32>
    %95 = arith.mulf %94, %77 : vector<8x256xf32>
    %cst_24 = arith.constant 0.322467119 : f32
    %96 = vector.broadcast %cst_24 : f32 to vector<8x256xf32>
    %97 = arith.addf %95, %96 : vector<8x256xf32>
    %98 = arith.mulf %97, %77 : vector<8x256xf32>
    %cst_25 = arith.constant 2.44513416 : f32
    %99 = vector.broadcast %cst_25 : f32 to vector<8x256xf32>
    %100 = arith.addf %98, %99 : vector<8x256xf32>
    %101 = arith.mulf %100, %77 : vector<8x256xf32>
    %cst_26 = arith.constant 3.7544086 : f32
    %102 = vector.broadcast %cst_26 : f32 to vector<8x256xf32>
    %103 = arith.addf %101, %102 : vector<8x256xf32>
    %104 = arith.mulf %103, %77 : vector<8x256xf32>
    %cst_27 = arith.constant 1.000000e+00 : f32
    %105 = vector.broadcast %cst_27 : f32 to vector<8x256xf32>
    %106 = arith.addf %104, %105 : vector<8x256xf32>
    %107 = arith.divf %93, %106 : vector<8x256xf32>
    %cst_28 = arith.constant 5.000000e-01 : f32
    %108 = vector.broadcast %cst_28 : f32 to vector<8x256xf32>
    %109 = arith.cmpf ogt, %33, %108 : vector<8x256xf32>
    %cst_29 = arith.constant 0.000000e+00 : f32
    %110 = vector.broadcast %cst_29 : f32 to vector<8x256xf32>
    %111 = arith.subf %110, %107 : vector<8x256xf32>
    %112 = arith.select %109, %111, %107 : vector<8x256xi1>, vector<8x256xf32>
    %113 = math.absf %35 : vector<8x256xf32>
    %cst_30 = arith.constant 4.757500e-01 : f32
    %114 = vector.broadcast %cst_30 : f32 to vector<8x256xf32>
    %115 = arith.cmpf ole, %113, %114 : vector<8x256xf32>
    %116 = arith.select %115, %70, %112 : vector<8x256xi1>, vector<8x256xf32>
    %cst_31 = arith.constant 1.500000e-01 : f32
    %117 = vector.broadcast %cst_31 : f32 to vector<8x256xf32>
    %118 = arith.mulf %117, %116 : vector<8x256xf32>
    %cst_32 = arith.constant 0.000000e+00 : f32
    %119 = vector.broadcast %cst_32 : f32 to vector<8x256xf32>
    %120 = arith.addf %119, %118 : vector<8x256xf32>
    %c0_33 = arith.constant 0 : index
    %c0_34 = arith.constant 0 : index
    %121 = vector.load %arg2[%c0_33, %c0_34] : memref<8x256xf32, #tpu.memory_space<vmem>>, vector<8x256xf32>
    %122 = arith.addf %121, %120 : vector<8x256xf32>
    %c0_35 = arith.constant 0 : index
    %c0_36 = arith.constant 0 : index
    %123 = vector.load %arg3[%c0_35, %c0_36] : memref<8x256xf32, #tpu.memory_space<vmem>>, vector<8x256xf32>
    tpu.vector_store %arg3[%c0_35, %c0_36], %122 {strides = array<i32>} : memref<8x256xf32, #tpu.memory_space<vmem>>, vector<8x256xf32>,
    return
  }
  func.func @transform_0(%arg0: i32, %arg1: memref<1xi32, #tpu.memory_space<smem>>) -> (i32, i32) {
    %c0_i32 = arith.constant 0 : i32
    %c0_i32_0 = arith.constant 0 : i32
    return %arg0, %c0_i32 : i32, i32
  }
  func.func @transform_1(%arg0: i32, %arg1: memref<1xi32, #tpu.memory_space<smem>>) -> (i32, i32) {
    %c0_i32 = arith.constant 0 : i32
    %c0_i32_0 = arith.constant 0 : i32
    return %arg0, %c0_i32 : i32, i32
  }
}

</mosaic_0001>

<bundles_post_ra>
// kernel: tpu_custom_call.1
= control target key start
LH: loop header
LB: loop body
LE: loop exit
PB: predicated region body
PF: predicated region fallthrough
CT: control target
= control target key end

     0   :  { %8 = vsyncpa [#allocation5], 0  ;;  %s354_s0 = inlined_call_operand.<no memory space> [shape: s32[1], index: 0, kind: input, shape index: {}]   ;;  %s355_s1 = inlined_call_operand.hbm [shape: f32[8,256], index: 1, kind: input, shape index: {}]   ;;  %s356_s2 = inlined_call_operand.hbm [shape: f32[8,256], index: 2, kind: output, shape index: {}]  }
   0x1   :  { %9 = vsyncpa [#allocation6], 0  ;;  %s280_s9 = smov [#allocation4]  }
   0x2   :  { %s16_s10 = sshll.u32 %s280_s9, 4  ;;  %s17_s10 = int_to_ptr.vmem [resolvable:$true] %s16_s10 }
   0x3   :  { %s244_s11 = scalar_lea.vmem %s17_s10, 256  ;;  %p249_p1 = scmp.lt.s32.totalorder %s17_s10, %s17_s10 }
   0x4   :  { %p245_p0 = scmp.ne.s32.totalorder %s17_s10, %s244_s11  ;;  %p250_p2 = scmp.lt.s32.totalorder %s244_s11, %s244_s11 }
   0x6   :  { %p251_p3 = por %p250_p2, %p249_p1 }
   0x8   :  { %p252_p4 = pnand %p251_p3, %p245_p0 }
   0xa   :  { %255 = shalt.err (!%p252_p4)
}
   0xb   :  { %19 = dma.hbm_to_vmem [thread:$0]  %s355_s1, 256, %s17_s10, [#allocation5]  }
   0xc   :  { %276 = dma.done.wait [#allocation5], 256  }
   0xd   :  { %277 = vsyncadd [#allocation5], 4294967040  ;;  %v23_v0 = vlaneseq  ;;  %s37_s16 = smul.u32 2246822519, %s354_s0  ;;  %s281_s0 = smov [#allocation7]  }
   0xe   :  { %s207_s1 = sshll.u32 %s281_s0, 4  ;;  %s208_s1 = int_to_ptr.vmem [resolvable:$true] %s207_s1 }
   0xf   :  { %v24_v1 = vshrl.u32 %v23_v0, 7  ;;  %v26_v2 = vand.u32 127, %v23_v0  ;;  %v38_v7 = vstv %s37_s16  ;;  %s256_s17 = scalar_lea.vmem %s208_s1, 256  ;;  %p261_p6 = scmp.lt.s32.totalorder %s208_s1, %s208_s1 }
  0x10   :  { %p257_p5 = scmp.ne.s32.totalorder %s208_s1, %s256_s17  ;;  %p262_p7 = scmp.lt.s32.totalorder %s256_s17, %s256_s17 }
  0x11   :  { %v31_v3 = vmul.u32 256, %v24_v1  ;;  %v27_v4 = vadd.s32 128, %v26_v2 }
  0x12   :  { %p263_p8 = por %p262_p7, %p261_p6 }
  0x13   :  { %v32_v5 = vadd.s32 %v31_v3, %v26_v2  ;;  %v33_v6 = vadd.s32 %v31_v3, %v27_v4 }
  0x14   :  { %p264_p9 = pnand %p263_p8, %p257_p5 }
  0x15   :  { %v35_v8 = vmul.u32 2654435761, %v32_v5  ;;  %v36_v9 = vmul.u32 2654435761, %v33_v6 }
  0x17   :  { %v39_v10 = vadd.s32 %v38_v7, %v35_v8  ;;  %v40_v11 = vadd.s32 %v38_v7, %v36_v9 }
  0x19   :  { %v41_v12 = vshrl.u32 %v39_v10, 16  ;;  %v42_v13 = vshrl.u32 %v40_v11, 16 }
  0x1b   :  { %v43_v14 = vxor.u32 %v41_v12, %v39_v10  ;;  %v44_v15 = vxor.u32 %v42_v13, %v40_v11 }
  0x1d   :  { %v45_v16 = vmul.u32 2146121005, %v43_v14  ;;  %v46_v17 = vmul.u32 2146121005, %v44_v15 }
  0x1f   :  { %v47_v18 = vshrl.u32 %v45_v16, 15  ;;  %v48_v19 = vshrl.u32 %v46_v17, 15 }
  0x21   :  { %v49_v20 = vxor.u32 %v47_v18, %v45_v16  ;;  %v50_v21 = vxor.u32 %v48_v19, %v46_v17 }
  0x23   :  { %v51_v22 = vmul.u32 2221713035, %v49_v20  ;;  %v52_v23 = vmul.u32 2221713035, %v50_v21 }
  0x25   :  { %v53_v24 = vshrl.u32 %v51_v22, 16  ;;  %v54_v25 = vshrl.u32 %v52_v23, 16 }
  0x27   :  { %v55_v26 = vxor.u32 %v53_v24, %v51_v22  ;;  %v56_v27 = vxor.u32 %v54_v25, %v52_v23 }
  0x29   :  { %v57_v28 = vshrl.u32 %v55_v26, 9  ;;  %v58_v29 = vshrl.u32 %v56_v27, 9 }
  0x2b   :  { %v59_v30 = vcvt.s32.f32 %v57_v28  ;;  %v60_v31 = vcvt.s32.f32 %v58_v29 }
  0x2d   :  { %v61_v32 = vadd.f32 0.5, %v59_v30  ;;  %v62_v33 = vadd.f32 0.5, %v60_v31 }
  0x2f   :  { %v303_v34 = vmul.f32 1.1920929e-07, %v61_v32  ;;  %v305_v35 = vmul.f32 1.1920929e-07, %v62_v33 }
  0x31   :  { %v115_v36 = vsub.f32 1.0, %v303_v34  ;;  %v116_v37 = vsub.f32 1.0, %v305_v35  ;;  %v312_v40 = vadd.f32 -0.5, %v303_v34  ;;  %v315_v41 = vadd.f32 -0.5, %v305_v35 }
  0x32   :  { %vm179_vm4 = vcmp.gt.f32.partialorder %v303_v34, 0.5  ;;  %vm180_vm6 = vcmp.gt.f32.partialorder %v305_v35, 0.5 }
  0x33   :  { %v117_v38 = vmin.f32 %v303_v34, %v115_v36  ;;  %v118_v39 = vmin.f32 %v305_v35, %v116_v37  ;;  %v319_v42 = vmul.f32 %v312_v40, %v312_v40  ;;  %v323_v43 = vmul.f32 %v315_v41, %v315_v41 }
  0x35   :  { %220 = vlog2.f32 %v117_v38  ;;  %v89_v44 = vmul.f32 -54.476097, %v319_v42  ;;  %v90_v48 = vmul.f32 -54.476097, %v323_v43  ;;  %v69_v55 = vmul.f32 -39.69683, %v319_v42 }
  0x36   :  { %222 = vlog2.f32 %v118_v39  ;;  %v70_v59 = vmul.f32 -39.69683, %v323_v43 }
  0x37   :  { %v91_v49 = vadd.f32 161.58583, %v89_v44  ;;  %v92_v52 = vadd.f32 161.58583, %v90_v48  ;;  %v71_v58 = vadd.f32 220.9461, %v69_v55 }
  0x38   :  { %v72_v63 = vadd.f32 220.9461, %v70_v59 }
  0x39   :  { %v93_v54 = vmul.f32 %v91_v49, %v319_v42  ;;  %v94_v56 = vmul.f32 %v92_v52, %v323_v43  ;;  %v73_v62 = vmul.f32 %v71_v58, %v319_v42 }
  0x3a   :  { %v74_v7 = vmul.f32 %v72_v63, %v323_v43 }
  0x3b   :  { %v95_v57 = vadd.f32 -155.69897, %v93_v54  ;;  %v96_v60 = vadd.f32 -155.69897, %v94_v56  ;;  %v75_v5 = vadd.f32 -275.9285, %v73_v62 }
  0x3c   :  { %v76_v18 = vadd.f32 -275.9285, %v74_v7 }
  0x3d   :  { %v97_v61 = vmul.f32 %v95_v57, %v319_v42  ;;  %v98_v0 = vmul.f32 %v96_v60, %v323_v43  ;;  %v77_v20 = vmul.f32 %v75_v5, %v319_v42 }
  0x3e   :  { %v78_v33 = vmul.f32 %v76_v18, %v323_v43 }
  0x3f   :  { %v99_v2 = vadd.f32 66.801315, %v97_v61  ;;  %v100_v8 = vadd.f32 66.801315, %v98_v0  ;;  %v79_v31 = vadd.f32 138.35776, %v77_v20 }
  0x41   :  { %v101_v10 = vmul.f32 %v99_v2, %v319_v42  ;;  %v102_v22 = vmul.f32 %v100_v8, %v323_v43  ;;  %v81_v49 = vmul.f32 %v79_v31, %v319_v42  ;;  %v196_v31 = vld [vmem:[#allocation4 + $0x8] sm:$0xff] }
  0x42   :  { %v221_v45 = vpop.eup %220 }
  0x43   :  { %v223_v46 = vpop.eup %222  ;;  %v120_v47 = vmul.f32 0.6931472, %v221_v45  ;;  %v103_v21 = vadd.f32 -13.280682, %v101_v10  ;;  %v104_v39 = vadd.f32 -13.280682, %v102_v22 }
  0x44   :  { %v122_v50 = vmul.f32 0.6931472, %v223_v46  ;;  %v83_v59 = vadd.f32 -30.664799, %v81_v49 }
  0x45   :  { %v123_v51 = vmul.f32 -2.0, %v120_v47  ;;  %v105_v32 = vmul.f32 %v103_v21, %v319_v42  ;;  %v106_v54 = vmul.f32 %v104_v39, %v323_v43 }
  0x46   :  { %v124_v53 = vmul.f32 -2.0, %v122_v50  ;;  %v85_v2 = vmul.f32 %v83_v59, %v319_v42 }
  0x47   :  { %224 = vrsqrt.f32 %v123_v51  ;;  %vm127_vm0 = vcmp.eq.f32.partialorder %v123_v51, inf  ;;  %v130_v3 = vand.u32 2147483648, %v123_v51  ;;  %vm129_vm1 = vcmp.eq.f32.partialorder %v123_v51, 0.0 }
  0x48   :  { %226 = vrsqrt.f32 %v124_v53  ;;  %vm134_vm2 = vcmp.eq.f32.partialorder %v124_v53, inf  ;;  %v137_v12 = vand.u32 2147483648, %v124_v53  ;;  %vm136_vm3 = vcmp.eq.f32.partialorder %v124_v53, 0.0 }
  0x49   :  { %v107_v50 = vadd.f32 1.0, %v105_v32  ;;  %v108_v63 = vadd.f32 1.0, %v106_v54  ;;  %v87_v7 = vadd.f32 2.5066283, %v85_v2 }
  0x4b   :  { %228 = vrcp.f32 %v107_v50 }
  0x54   :  { %v225_v1 = vpop.eup %224 }
  0x55   :  { %v126_v4 = vmul.f32 %v225_v1, %v123_v51  ;;  %v227_v9 = vpop.eup %226 }
  0x56   :  { %v133_v15 = vmul.f32 %v227_v9, %v124_v53 }
  0x57   :  { %v128_v6 = vsel %vm127_vm0, %v123_v51, %v126_v4 }
  0x58   :  { %v131_v11 = vsel %vm129_vm1, %v130_v3, %v128_v6  ;;  %v135_v19 = vsel %vm134_vm2, %v124_v53, %v133_v15  ;;  %v80_v53 = vadd.f32 138.35776, %v78_v33  ;;  %v185_v15 = vand.u32 2147483647, %v312_v40 }
  0x59   :  { %v139_v13 = vmul.f32 -0.007784894, %v131_v11  ;;  %v159_v14 = vmul.f32 0.007784696, %v131_v11  ;;  %v138_v23 = vsel %vm136_vm3, %v137_v12, %v135_v19  ;;  %v109_v12 = vmul.f32 %v312_v40, %v87_v7 }
  0x5a   :  { %v140_v26 = vmul.f32 -0.007784894, %v138_v23  ;;  %v160_v27 = vmul.f32 0.007784696, %v138_v23  ;;  %v82_v62 = vmul.f32 %v80_v53, %v323_v43  ;;  %vm187_vm5 = vcmp.le.f32.partialorder %v185_v15, 0.47575 }
  0x5b   :  { %v141_v16 = vadd.f32 -0.32239646, %v139_v13  ;;  %v161_v17 = vadd.f32 0.32246712, %v159_v14  ;;  %v229_v14 = vpop.eup %228 }
  0x5c   :  { %v142_v30 = vadd.f32 -0.32239646, %v140_v26  ;;  %v162_v36 = vadd.f32 0.32246712, %v160_v27  ;;  %v84_v5 = vadd.f32 -30.664799, %v82_v62  ;;  %v112_v18 = vmul.f32 %v229_v14, %v109_v12 }
  0x5d   :  { %v143_v24 = vmul.f32 %v141_v16, %v131_v11  ;;  %v163_v25 = vmul.f32 %v161_v17, %v131_v11 }
  0x5e   :  { %v144_v44 = vmul.f32 %v142_v30, %v138_v23  ;;  %v164_v45 = vmul.f32 %v162_v36, %v138_v23  ;;  %v86_v9 = vmul.f32 %v84_v5, %v323_v43  ;;  %v186_v43 = vand.u32 2147483647, %v315_v41 }
  0x5f   :  { %v145_v28 = vadd.f32 -2.4007583, %v143_v24  ;;  %v165_v29 = vadd.f32 2.4451342, %v163_v25  ;;  %v195_v25 = vld [vmem:[#allocation4] sm:$0xff] }
  0x60   :  { %v146_v48 = vadd.f32 -2.4007583, %v144_v44  ;;  %v166_v51 = vadd.f32 2.4451342, %v164_v45  ;;  %v88_v16 = vadd.f32 2.5066283, %v86_v9 }
  0x61   :  { %v147_v37 = vmul.f32 %v145_v28, %v131_v11  ;;  %v167_v38 = vmul.f32 %v165_v29, %v131_v11  ;;  %vm188_vm7 = vcmp.le.f32.partialorder %v186_v43, 0.47575 }
  0x62   :  { %v148_v55 = vmul.f32 %v146_v48, %v138_v23  ;;  %v168_v56 = vmul.f32 %v166_v51, %v138_v23 }
  0x63   :  { %v149_v46 = vadd.f32 -2.5497324, %v147_v37  ;;  %v169_v47 = vadd.f32 3.7544086, %v167_v38 }
  0x64   :  { %v150_v60 = vadd.f32 -2.5497324, %v148_v55  ;;  %v170_v61 = vadd.f32 3.7544086, %v168_v56 }
  0x65   :  { %v171_v52 = vmul.f32 %v169_v47, %v131_v11  ;;  %v151_v57 = vmul.f32 %v149_v46, %v131_v11 }
  0x66   :  { %v172_v0 = vmul.f32 %v170_v61, %v138_v23  ;;  %v152_v3 = vmul.f32 %v150_v60, %v138_v23 }
  0x67   :  { %v173_v58 = vadd.f32 1.0, %v171_v52  ;;  %v153_v1 = vadd.f32 4.3746643, %v151_v57 }
  0x68   :  { %v174_v4 = vadd.f32 1.0, %v172_v0  ;;  %v154_v8 = vadd.f32 4.3746643, %v152_v3 }
  0x69   :  { %230 = vrcp.f32 %v173_v58  ;;  %v155_v6 = vmul.f32 %v153_v1, %v131_v11  ;;  %v110_v11 = vmul.f32 %v315_v41, %v88_v16 }
  0x6a   :  { %232 = vrcp.f32 %v108_v63  ;;  %v156_v13 = vmul.f32 %v154_v8, %v138_v23 }
  0x6b   :  { %234 = vrcp.f32 %v174_v4  ;;  %v157_v10 = vadd.f32 2.938164, %v155_v6 }
  0x6c   :  { %v158_v19 = vadd.f32 2.938164, %v156_v13 }
  0x76   :  { %v231_v17 = vpop.eup %230 }
  0x77   :  { %v176_v42 = vmul.f32 %v231_v17, %v157_v10  ;;  %v233_v21 = vpop.eup %232 }
  0x78   :  { %v235_v22 = vpop.eup %234  ;;  %v114_v27 = vmul.f32 %v233_v21, %v110_v11 }
  0x79   :  { %v181_v20 = vsub.f32 0.0, %v176_v42  ;;  %v178_v26 = vmul.f32 %v235_v22, %v158_v19 }
  0x7b   :  { %v183_v24 = vsel %vm179_vm4, %v181_v20, %v176_v42  ;;  %v182_v28 = vsub.f32 0.0, %v178_v26 }
  0x7c   :  { %v189_v23 = vsel %vm187_vm5, %v112_v18, %v183_v24 }
  0x7d   :  { %v191_v40 = vmul.f32 0.15, %v189_v23  ;;  %v184_v29 = vsel %vm180_vm6, %v182_v28, %v178_v26 }
  0x7e   :  { %v190_v30 = vsel %vm188_vm7, %v114_v27, %v184_v29 }
  0x7f   :  { %v197_v34 = vadd.f32 %v195_v25, %v191_v40  ;;  %v192_v32 = vmul.f32 0.15, %v190_v30 }
  0x81   :  { %199 = vst [vmem:[#allocation7] sm:$0xff] %v197_v34  ;;  %v198_v41 = vadd.f32 %v196_v31, %v192_v32 }
  0x83   :  { %200 = vst [vmem:[#allocation7 + $0x8] sm:$0xff] %v198_v41 }
  0x84   :  { %267 = shalt.err (!%p264_p9)
}
  0x85   :  { %210 = dma.vmem_to_hbm [thread:$0]  %s208_s1, 256, %s356_s2, [#allocation6]  }
  0x86   :  { %278 = dma.done.wait [#allocation6], 256  }
  0x87   :  { %279 = vsyncadd [#allocation6], 4294967040 }
  0x88   :  { %214 = vsyncpa [#allocation5], 1 }
  0x89   :  { %215 = vsyncpa [#allocation6], 1 }

</bundles_post_ra>
